<compile_context>
chip_gen: v5e
topology: v5e:2x2
jax: 0.10.0
libtpu: 0.0.40
codegen_flags: <defaults>
</compile_context>

<pallas_src>
import math
import functools

import jax
import jax.numpy as jnp
from jax.experimental import pallas as pl
from jax.experimental.pallas import tpu as pltpu


def make_embedding(dim, max_length=10000):
    """JAX port of PositionalEmbedding.make_embedding (parameter setup / glue)."""
    position = jnp.arange(0, max_length, dtype=jnp.float32)[:, None]          # (L, 1)
    div_term = jnp.exp(
        jnp.arange(0, dim, 2, dtype=jnp.float32)
        * (-math.log(max_length / 2 / math.pi) / dim)
    )                                                                          # (ceil(dim/2),)
    sin = jnp.sin(position * div_term)
    cos = jnp.cos(position * div_term)
    emb = jnp.zeros((max_length, dim), dtype=jnp.float32)
    emb = emb.at[:, 0::2].set(sin)
    emb = emb.at[:, 1::2].set(cos[:, : dim // 2])      # works for odd dim too
    return emb


def _round_up(a, b):
    return (a + b - 1) // b * b


def _gather_kernel(idx_ref, emb_ref, out_ref, *, block_rows, pack, dim):
    """Gather `block_rows` table rows for grid step i, lane-dense packed.

    idx_ref : SMEM (n_padded,) int32            -- scalar-prefetched flat indices
    emb_ref : VMEM (max_length, dim)            -- full table, resident (single copy)
    out_ref : VMEM (block_rows // pack, pack*dim) -- lane-dense output tile
    """
    i = pl.program_id(0)
    base = i * block_rows
    packed_rows = block_rows // pack
    for p in range(packed_rows):            # static unroll
        for c in range(pack):               # static unroll; pack*dim == 128 when possible
            idx = idx_ref[base + p * pack + c]
            out_ref[pl.ds(p, 1), pl.ds(c * dim, dim)] = emb_ref[pl.ds(idx, 1), :]


def positional_embedding_lookup(x, embedding, *, block_rows=256):
    """Pallas equivalent of `embedding[x]`."""
    orig_shape = x.shape
    max_length, dim = embedding.shape

    # Lane-dense packing factor: put `pack` gathered rows side-by-side in 128 lanes.
    pack = 128 // dim if (dim < 128 and 128 % dim == 0) else 1

    flat = x.reshape(-1).astype(jnp.int32)
    flat = jnp.clip(flat, 0, max_length - 1)       # guard OOB (no runtime check in-kernel)
    n = flat.shape[0]

    # Block size: multiple of 8*pack so the packed output tile is (8k, pack*dim),
    # clamped so tiny inputs don't gather hundreds of dummy rows.
    row_align = 8 * pack
    block_rows = max(row_align, min(_round_up(block_rows, row_align),
                                    _round_up(n, row_align)))

    pad = (-n) % block_rows
    if pad:
        flat = jnp.concatenate([flat, jnp.zeros((pad,), jnp.int32)])
    n_padded = n + pad

    kernel = functools.partial(_gather_kernel, block_rows=block_rows,
                               pack=pack, dim=dim)

    out_packed = pl.pallas_call(
        kernel,
        out_shape=jax.ShapeDtypeStruct((n_padded // pack, pack * dim), embedding.dtype),
        grid_spec=pltpu.PrefetchScalarGridSpec(
            num_scalar_prefetch=1,                     # flat indices -> SMEM
            grid=(n_padded // block_rows,),
            in_specs=[
                # Whole table resident in VMEM, single-buffered (no pipelining).
                pl.BlockSpec(memory_space=pltpu.MemorySpace.VMEM),
            ],
            out_specs=pl.BlockSpec((block_rows // pack, pack * dim),
                                   lambda i, idx: (i, 0)),
        ),
        compiler_params=pltpu.CompilerParams(
            dimension_semantics=("parallel",),         # independent steps -> v7x dual-TC
        ),
    )(flat, embedding)

    out = out_packed.reshape(n_padded, dim)[:n]
    return out.reshape(orig_shape + (dim,))


class PositionalEmbedding:
    """Thin wrapper mirroring the PyTorch module's interface."""

    def __init__(self, dim, max_length=10000):
        self.embedding = make_embedding(dim, max_length)

    def __call__(self, x):
        return positional_embedding_lookup(x, self.embedding)


if __name__ == "__main__":
    dim = 32
    max_length = 10000
    batch, seq = 2, 8

    key = jax.random.PRNGKey(0)
    # integer index tensor, shape (batch, seq), values in [0, max_length)
    x = jax.random.randint(key, (batch, seq), 0, max_length, dtype=jnp.int32)

    module = PositionalEmbedding(dim, max_length)
    out = jax.block_until_ready(module(x))

    # reference check (plain JAX gather) -- pure row copies, so exact match
    ref = module.embedding[x]
    assert out.shape == (batch, seq, dim)
    assert out.dtype == jnp.float32
    assert jnp.array_equal(out, ref)

    print("KERNEL_OK")
</pallas_src>

<mosaic_0001>
module attributes {stable_mosaic.version = 11 : i64} {
  func.func @_gather_kernel(%arg0: i32, %arg1: memref<32xi32, #tpu.memory_space<smem>>, %arg2: memref<10000x32xf32, #tpu.memory_space<vmem>>, %arg3: memref<8x128xf32, #tpu.memory_space<vmem>>) attributes {dimension_semantics = [#tpu.dimension_semantics<parallel>], iteration_bounds = array<i64: 1>, scalar_prefetch = 1 : i64, scratch_operands = 0 : i64, tpu.core_type = #tpu.core_type<tc>, window_params = [{pipeline_mode = #tpu.pipeline_mode<synchronous>, transform_indices = @transform_0, window_bounds = array<i64: 10000, 32>}, {transform_indices = @transform_1, window_bounds = array<i64: 8, 128>}]} {
    %c32_i32 = arith.constant 32 : i32
    %0 = arith.muli %arg0, %c32_i32 : i32
    %c0_i32 = arith.constant 0 : i32
    %1 = arith.addi %0, %c0_i32 : i32
    %c0_i32_0 = arith.constant 0 : i32
    %2 = arith.addi %1, %c0_i32_0 : i32
    %3 = arith.index_cast %2 : i32 to index
    %4 = memref.load %arg1[%3] : memref<32xi32, #tpu.memory_space<smem>>
    %5 = arith.index_cast %4 : i32 to index
    %c0 = arith.constant 0 : index
    %6 = vector.load %arg2[%5, %c0] : memref<10000x32xf32, #tpu.memory_space<vmem>>, vector<1x32xf32>
    %c0_1 = arith.constant 0 : index
    %c0_2 = arith.constant 0 : index
    %7 = vector.load %arg3[%c0_1, %c0_2] : memref<8x128xf32, #tpu.memory_space<vmem>>, vector<1x32xf32>
    tpu.vector_store %arg3[%c0_1, %c0_2], %6 {strides = array<i32>} : memref<8x128xf32, #tpu.memory_space<vmem>>, vector<1x32xf32>,
    %c0_i32_3 = arith.constant 0 : i32
    %8 = arith.addi %0, %c0_i32_3 : i32
    %c1_i32 = arith.constant 1 : i32
    %9 = arith.addi %8, %c1_i32 : i32
    %10 = arith.index_cast %9 : i32 to index
    %11 = memref.load %arg1[%10] : memref<32xi32, #tpu.memory_space<smem>>
    %12 = arith.index_cast %11 : i32 to index
    %c0_4 = arith.constant 0 : index
    %13 = vector.load %arg2[%12, %c0_4] : memref<10000x32xf32, #tpu.memory_space<vmem>>, vector<1x32xf32>
    %c0_5 = arith.constant 0 : index
    %c32 = arith.constant 32 : index
    %14 = vector.load %arg3[%c0_5, %c32] : memref<8x128xf32, #tpu.memory_space<vmem>>, vector<1x32xf32>
    tpu.vector_store %arg3[%c0_5, %c32], %13 {strides = array<i32>} : memref<8x128xf32, #tpu.memory_space<vmem>>, vector<1x32xf32>,
    %c0_i32_6 = arith.constant 0 : i32
    %15 = arith.addi %0, %c0_i32_6 : i32
    %c2_i32 = arith.constant 2 : i32
    %16 = arith.addi %15, %c2_i32 : i32
    %17 = arith.index_cast %16 : i32 to index
    %18 = memref.load %arg1[%17] : memref<32xi32, #tpu.memory_space<smem>>
    %19 = arith.index_cast %18 : i32 to index
    %c0_7 = arith.constant 0 : index
    %20 = vector.load %arg2[%19, %c0_7] : memref<10000x32xf32, #tpu.memory_space<vmem>>, vector<1x32xf32>
    %c0_8 = arith.constant 0 : index
    %c64 = arith.constant 64 : index
    %21 = vector.load %arg3[%c0_8, %c64] : memref<8x128xf32, #tpu.memory_space<vmem>>, vector<1x32xf32>
    tpu.vector_store %arg3[%c0_8, %c64], %20 {strides = array<i32>} : memref<8x128xf32, #tpu.memory_space<vmem>>, vector<1x32xf32>,
    %c0_i32_9 = arith.constant 0 : i32
    %22 = arith.addi %0, %c0_i32_9 : i32
    %c3_i32 = arith.constant 3 : i32
    %23 = arith.addi %22, %c3_i32 : i32
    %24 = arith.index_cast %23 : i32 to index
    %25 = memref.load %arg1[%24] : memref<32xi32, #tpu.memory_space<smem>>
    %26 = arith.index_cast %25 : i32 to index
    %c0_10 = arith.constant 0 : index
    %27 = vector.load %arg2[%26, %c0_10] : memref<10000x32xf32, #tpu.memory_space<vmem>>, vector<1x32xf32>
    %c0_11 = arith.constant 0 : index
    %c96 = arith.constant 96 : index
    %28 = vector.load %arg3[%c0_11, %c96] : memref<8x128xf32, #tpu.memory_space<vmem>>, vector<1x32xf32>
    tpu.vector_store %arg3[%c0_11, %c96], %27 {strides = array<i32>} : memref<8x128xf32, #tpu.memory_space<vmem>>, vector<1x32xf32>,
    %c4_i32 = arith.constant 4 : i32
    %29 = arith.addi %0, %c4_i32 : i32
    %c0_i32_12 = arith.constant 0 : i32
    %30 = arith.addi %29, %c0_i32_12 : i32
    %31 = arith.index_cast %30 : i32 to index
    %32 = memref.load %arg1[%31] : memref<32xi32, #tpu.memory_space<smem>>
    %33 = arith.index_cast %32 : i32 to index
    %c0_13 = arith.constant 0 : index
    %34 = vector.load %arg2[%33, %c0_13] : memref<10000x32xf32, #tpu.memory_space<vmem>>, vector<1x32xf32>
    %c1 = arith.constant 1 : index
    %c0_14 = arith.constant 0 : index
    %35 = vector.load %arg3[%c1, %c0_14] : memref<8x128xf32, #tpu.memory_space<vmem>>, vector<1x32xf32>
    tpu.vector_store %arg3[%c1, %c0_14], %34 {strides = array<i32>} : memref<8x128xf32, #tpu.memory_space<vmem>>, vector<1x32xf32>,
    %c4_i32_15 = arith.constant 4 : i32
    %36 = arith.addi %0, %c4_i32_15 : i32
    %c1_i32_16 = arith.constant 1 : i32
    %37 = arith.addi %36, %c1_i32_16 : i32
    %38 = arith.index_cast %37 : i32 to index
    %39 = memref.load %arg1[%38] : memref<32xi32, #tpu.memory_space<smem>>
    %40 = arith.index_cast %39 : i32 to index
    %c0_17 = arith.constant 0 : index
    %41 = vector.load %arg2[%40, %c0_17] : memref<10000x32xf32, #tpu.memory_space<vmem>>, vector<1x32xf32>
    %c1_18 = arith.constant 1 : index
    %c32_19 = arith.constant 32 : index
    %42 = vector.load %arg3[%c1_18, %c32_19] : memref<8x128xf32, #tpu.memory_space<vmem>>, vector<1x32xf32>
    tpu.vector_store %arg3[%c1_18, %c32_19], %41 {strides = array<i32>} : memref<8x128xf32, #tpu.memory_space<vmem>>, vector<1x32xf32>,
    %c4_i32_20 = arith.constant 4 : i32
    %43 = arith.addi %0, %c4_i32_20 : i32
    %c2_i32_21 = arith.constant 2 : i32
    %44 = arith.addi %43, %c2_i32_21 : i32
    %45 = arith.index_cast %44 : i32 to index
    %46 = memref.load %arg1[%45] : memref<32xi32, #tpu.memory_space<smem>>
    %47 = arith.index_cast %46 : i32 to index
    %c0_22 = arith.constant 0 : index
    %48 = vector.load %arg2[%47, %c0_22] : memref<10000x32xf32, #tpu.memory_space<vmem>>, vector<1x32xf32>
    %c1_23 = arith.constant 1 : index
    %c64_24 = arith.constant 64 : index
    %49 = vector.load %arg3[%c1_23, %c64_24] : memref<8x128xf32, #tpu.memory_space<vmem>>, vector<1x32xf32>
    tpu.vector_store %arg3[%c1_23, %c64_24], %48 {strides = array<i32>} : memref<8x128xf32, #tpu.memory_space<vmem>>, vector<1x32xf32>,
    %c4_i32_25 = arith.constant 4 : i32
    %50 = arith.addi %0, %c4_i32_25 : i32
    %c3_i32_26 = arith.constant 3 : i32
    %51 = arith.addi %50, %c3_i32_26 : i32
    %52 = arith.index_cast %51 : i32 to index
    %53 = memref.load %arg1[%52] : memref<32xi32, #tpu.memory_space<smem>>
    %54 = arith.index_cast %53 : i32 to index
    %c0_27 = arith.constant 0 : index
    %55 = vector.load %arg2[%54, %c0_27] : memref<10000x32xf32, #tpu.memory_space<vmem>>, vector<1x32xf32>
    %c1_28 = arith.constant 1 : index
    %c96_29 = arith.constant 96 : index
    %56 = vector.load %arg3[%c1_28, %c96_29] : memref<8x128xf32, #tpu.memory_space<vmem>>, vector<1x32xf32>
    tpu.vector_store %arg3[%c1_28, %c96_29], %55 {strides = array<i32>} : memref<8x128xf32, #tpu.memory_space<vmem>>, vector<1x32xf32>,
    %c8_i32 = arith.constant 8 : i32
    %57 = arith.addi %0, %c8_i32 : i32
    %c0_i32_30 = arith.constant 0 : i32
    %58 = arith.addi %57, %c0_i32_30 : i32
    %59 = arith.index_cast %58 : i32 to index
    %60 = memref.load %arg1[%59] : memref<32xi32, #tpu.memory_space<smem>>
    %61 = arith.index_cast %60 : i32 to index
    %c0_31 = arith.constant 0 : index
    %62 = vector.load %arg2[%61, %c0_31] : memref<10000x32xf32, #tpu.memory_space<vmem>>, vector<1x32xf32>
    %c2 = arith.constant 2 : index
    %c0_32 = arith.constant 0 : index
    %63 = vector.load %arg3[%c2, %c0_32] : memref<8x128xf32, #tpu.memory_space<vmem>>, vector<1x32xf32>
    tpu.vector_store %arg3[%c2, %c0_32], %62 {strides = array<i32>} : memref<8x128xf32, #tpu.memory_space<vmem>>, vector<1x32xf32>,
    %c8_i32_33 = arith.constant 8 : i32
    %64 = arith.addi %0, %c8_i32_33 : i32
    %c1_i32_34 = arith.constant 1 : i32
    %65 = arith.addi %64, %c1_i32_34 : i32
    %66 = arith.index_cast %65 : i32 to index
    %67 = memref.load %arg1[%66] : memref<32xi32, #tpu.memory_space<smem>>
    %68 = arith.index_cast %67 : i32 to index
    %c0_35 = arith.constant 0 : index
    %69 = vector.load %arg2[%68, %c0_35] : memref<10000x32xf32, #tpu.memory_space<vmem>>, vector<1x32xf32>
    %c2_36 = arith.constant 2 : index
    %c32_37 = arith.constant 32 : index
    %70 = vector.load %arg3[%c2_36, %c32_37] : memref<8x128xf32, #tpu.memory_space<vmem>>, vector<1x32xf32>
    tpu.vector_store %arg3[%c2_36, %c32_37], %69 {strides = array<i32>} : memref<8x128xf32, #tpu.memory_space<vmem>>, vector<1x32xf32>,
    %c8_i32_38 = arith.constant 8 : i32
    %71 = arith.addi %0, %c8_i32_38 : i32
    %c2_i32_39 = arith.constant 2 : i32
    %72 = arith.addi %71, %c2_i32_39 : i32
    %73 = arith.index_cast %72 : i32 to index
    %74 = memref.load %arg1[%73] : memref<32xi32, #tpu.memory_space<smem>>
    %75 = arith.index_cast %74 : i32 to index
    %c0_40 = arith.constant 0 : index
    %76 = vector.load %arg2[%75, %c0_40] : memref<10000x32xf32, #tpu.memory_space<vmem>>, vector<1x32xf32>
    %c2_41 = arith.constant 2 : index
    %c64_42 = arith.constant 64 : index
    %77 = vector.load %arg3[%c2_41, %c64_42] : memref<8x128xf32, #tpu.memory_space<vmem>>, vector<1x32xf32>
    tpu.vector_store %arg3[%c2_41, %c64_42], %76 {strides = array<i32>} : memref<8x128xf32, #tpu.memory_space<vmem>>, vector<1x32xf32>,
    %c8_i32_43 = arith.constant 8 : i32
    %78 = arith.addi %0, %c8_i32_43 : i32
    %c3_i32_44 = arith.constant 3 : i32
    %79 = arith.addi %78, %c3_i32_44 : i32
    %80 = arith.index_cast %79 : i32 to index
    %81 = memref.load %arg1[%80] : memref<32xi32, #tpu.memory_space<smem>>
    %82 = arith.index_cast %81 : i32 to index
    %c0_45 = arith.constant 0 : index
    %83 = vector.load %arg2[%82, %c0_45] : memref<10000x32xf32, #tpu.memory_space<vmem>>, vector<1x32xf32>
    %c2_46 = arith.constant 2 : index
    %c96_47 = arith.constant 96 : index
    %84 = vector.load %arg3[%c2_46, %c96_47] : memref<8x128xf32, #tpu.memory_space<vmem>>, vector<1x32xf32>
    tpu.vector_store %arg3[%c2_46, %c96_47], %83 {strides = array<i32>} : memref<8x128xf32, #tpu.memory_space<vmem>>, vector<1x32xf32>,
    %c12_i32 = arith.constant 12 : i32
    %85 = arith.addi %0, %c12_i32 : i32
    %c0_i32_48 = arith.constant 0 : i32
    %86 = arith.addi %85, %c0_i32_48 : i32
    %87 = arith.index_cast %86 : i32 to index
    %88 = memref.load %arg1[%87] : memref<32xi32, #tpu.memory_space<smem>>
    %89 = arith.index_cast %88 : i32 to index
    %c0_49 = arith.constant 0 : index
    %90 = vector.load %arg2[%89, %c0_49] : memref<10000x32xf32, #tpu.memory_space<vmem>>, vector<1x32xf32>
    %c3 = arith.constant 3 : index
    %c0_50 = arith.constant 0 : index
    %91 = vector.load %arg3[%c3, %c0_50] : memref<8x128xf32, #tpu.memory_space<vmem>>, vector<1x32xf32>
    tpu.vector_store %arg3[%c3, %c0_50], %90 {strides = array<i32>} : memref<8x128xf32, #tpu.memory_space<vmem>>, vector<1x32xf32>,
    %c12_i32_51 = arith.constant 12 : i32
    %92 = arith.addi %0, %c12_i32_51 : i32
    %c1_i32_52 = arith.constant 1 : i32
    %93 = arith.addi %92, %c1_i32_52 : i32
    %94 = arith.index_cast %93 : i32 to index
    %95 = memref.load %arg1[%94] : memref<32xi32, #tpu.memory_space<smem>>
    %96 = arith.index_cast %95 : i32 to index
    %c0_53 = arith.constant 0 : index
    %97 = vector.load %arg2[%96, %c0_53] : memref<10000x32xf32, #tpu.memory_space<vmem>>, vector<1x32xf32>
    %c3_54 = arith.constant 3 : index
    %c32_55 = arith.constant 32 : index
    %98 = vector.load %arg3[%c3_54, %c32_55] : memref<8x128xf32, #tpu.memory_space<vmem>>, vector<1x32xf32>
    tpu.vector_store %arg3[%c3_54, %c32_55], %97 {strides = array<i32>} : memref<8x128xf32, #tpu.memory_space<vmem>>, vector<1x32xf32>,
    %c12_i32_56 = arith.constant 12 : i32
    %99 = arith.addi %0, %c12_i32_56 : i32
    %c2_i32_57 = arith.constant 2 : i32
    %100 = arith.addi %99, %c2_i32_57 : i32
    %101 = arith.index_cast %100 : i32 to index
    %102 = memref.load %arg1[%101] : memref<32xi32, #tpu.memory_space<smem>>
    %103 = arith.index_cast %102 : i32 to index
    %c0_58 = arith.constant 0 : index
    %104 = vector.load %arg2[%103, %c0_58] : memref<10000x32xf32, #tpu.memory_space<vmem>>, vector<1x32xf32>
    %c3_59 = arith.constant 3 : index
    %c64_60 = arith.constant 64 : index
    %105 = vector.load %arg3[%c3_59, %c64_60] : memref<8x128xf32, #tpu.memory_space<vmem>>, vector<1x32xf32>
    tpu.vector_store %arg3[%c3_59, %c64_60], %104 {strides = array<i32>} : memref<8x128xf32, #tpu.memory_space<vmem>>, vector<1x32xf32>,
    %c12_i32_61 = arith.constant 12 : i32
    %106 = arith.addi %0, %c12_i32_61 : i32
    %c3_i32_62 = arith.constant 3 : i32
    %107 = arith.addi %106, %c3_i32_62 : i32
    %108 = arith.index_cast %107 : i32 to index
    %109 = memref.load %arg1[%108] : memref<32xi32, #tpu.memory_space<smem>>
    %110 = arith.index_cast %109 : i32 to index
    %c0_63 = arith.constant 0 : index
    %111 = vector.load %arg2[%110, %c0_63] : memref<10000x32xf32, #tpu.memory_space<vmem>>, vector<1x32xf32>
    %c3_64 = arith.constant 3 : index
    %c96_65 = arith.constant 96 : index
    %112 = vector.load %arg3[%c3_64, %c96_65] : memref<8x128xf32, #tpu.memory_space<vmem>>, vector<1x32xf32>
    tpu.vector_store %arg3[%c3_64, %c96_65], %111 {strides = array<i32>} : memref<8x128xf32, #tpu.memory_space<vmem>>, vector<1x32xf32>,
    %c16_i32 = arith.constant 16 : i32
    %113 = arith.addi %0, %c16_i32 : i32
    %c0_i32_66 = arith.constant 0 : i32
    %114 = arith.addi %113, %c0_i32_66 : i32
    %115 = arith.index_cast %114 : i32 to index
    %116 = memref.load %arg1[%115] : memref<32xi32, #tpu.memory_space<smem>>
    %117 = arith.index_cast %116 : i32 to index
    %c0_67 = arith.constant 0 : index
    %118 = vector.load %arg2[%117, %c0_67] : memref<10000x32xf32, #tpu.memory_space<vmem>>, vector<1x32xf32>
    %c4 = arith.constant 4 : index
    %c0_68 = arith.constant 0 : index
    %119 = vector.load %arg3[%c4, %c0_68] : memref<8x128xf32, #tpu.memory_space<vmem>>, vector<1x32xf32>
    tpu.vector_store %arg3[%c4, %c0_68], %118 {strides = array<i32>} : memref<8x128xf32, #tpu.memory_space<vmem>>, vector<1x32xf32>,
    %c16_i32_69 = arith.constant 16 : i32
    %120 = arith.addi %0, %c16_i32_69 : i32
    %c1_i32_70 = arith.constant 1 : i32
    %121 = arith.addi %120, %c1_i32_70 : i32
    %122 = arith.index_cast %121 : i32 to index
    %123 = memref.load %arg1[%122] : memref<32xi32, #tpu.memory_space<smem>>
    %124 = arith.index_cast %123 : i32 to index
    %c0_71 = arith.constant 0 : index
    %125 = vector.load %arg2[%124, %c0_71] : memref<10000x32xf32, #tpu.memory_space<vmem>>, vector<1x32xf32>
    %c4_72 = arith.constant 4 : index
    %c32_73 = arith.constant 32 : index
    %126 = vector.load %arg3[%c4_72, %c32_73] : memref<8x128xf32, #tpu.memory_space<vmem>>, vector<1x32xf32>
    tpu.vector_store %arg3[%c4_72, %c32_73], %125 {strides = array<i32>} : memref<8x128xf32, #tpu.memory_space<vmem>>, vector<1x32xf32>,
    %c16_i32_74 = arith.constant 16 : i32
    %127 = arith.addi %0, %c16_i32_74 : i32
    %c2_i32_75 = arith.constant 2 : i32
    %128 = arith.addi %127, %c2_i32_75 : i32
    %129 = arith.index_cast %128 : i32 to index
    %130 = memref.load %arg1[%129] : memref<32xi32, #tpu.memory_space<smem>>
    %131 = arith.index_cast %130 : i32 to index
    %c0_76 = arith.constant 0 : index
    %132 = vector.load %arg2[%131, %c0_76] : memref<10000x32xf32, #tpu.memory_space<vmem>>, vector<1x32xf32>
    %c4_77 = arith.constant 4 : index
    %c64_78 = arith.constant 64 : index
    %133 = vector.load %arg3[%c4_77, %c64_78] : memref<8x128xf32, #tpu.memory_space<vmem>>, vector<1x32xf32>
    tpu.vector_store %arg3[%c4_77, %c64_78], %132 {strides = array<i32>} : memref<8x128xf32, #tpu.memory_space<vmem>>, vector<1x32xf32>,
    %c16_i32_79 = arith.constant 16 : i32
    %134 = arith.addi %0, %c16_i32_79 : i32
    %c3_i32_80 = arith.constant 3 : i32
    %135 = arith.addi %134, %c3_i32_80 : i32
    %136 = arith.index_cast %135 : i32 to index
    %137 = memref.load %arg1[%136] : memref<32xi32, #tpu.memory_space<smem>>
    %138 = arith.index_cast %137 : i32 to index
    %c0_81 = arith.constant 0 : index
    %139 = vector.load %arg2[%138, %c0_81] : memref<10000x32xf32, #tpu.memory_space<vmem>>, vector<1x32xf32>
    %c4_82 = arith.constant 4 : index
    %c96_83 = arith.constant 96 : index
    %140 = vector.load %arg3[%c4_82, %c96_83] : memref<8x128xf32, #tpu.memory_space<vmem>>, vector<1x32xf32>
    tpu.vector_store %arg3[%c4_82, %c96_83], %139 {strides = array<i32>} : memref<8x128xf32, #tpu.memory_space<vmem>>, vector<1x32xf32>,
    %c20_i32 = arith.constant 20 : i32
    %141 = arith.addi %0, %c20_i32 : i32
    %c0_i32_84 = arith.constant 0 : i32
    %142 = arith.addi %141, %c0_i32_84 : i32
    %143 = arith.index_cast %142 : i32 to index
    %144 = memref.load %arg1[%143] : memref<32xi32, #tpu.memory_space<smem>>
    %145 = arith.index_cast %144 : i32 to index
    %c0_85 = arith.constant 0 : index
    %146 = vector.load %arg2[%145, %c0_85] : memref<10000x32xf32, #tpu.memory_space<vmem>>, vector<1x32xf32>
    %c5 = arith.constant 5 : index
    %c0_86 = arith.constant 0 : index
    %147 = vector.load %arg3[%c5, %c0_86] : memref<8x128xf32, #tpu.memory_space<vmem>>, vector<1x32xf32>
    tpu.vector_store %arg3[%c5, %c0_86], %146 {strides = array<i32>} : memref<8x128xf32, #tpu.memory_space<vmem>>, vector<1x32xf32>,
    %c20_i32_87 = arith.constant 20 : i32
    %148 = arith.addi %0, %c20_i32_87 : i32
    %c1_i32_88 = arith.constant 1 : i32
    %149 = arith.addi %148, %c1_i32_88 : i32
    %150 = arith.index_cast %149 : i32 to index
    %151 = memref.load %arg1[%150] : memref<32xi32, #tpu.memory_space<smem>>
    %152 = arith.index_cast %151 : i32 to index
    %c0_89 = arith.constant 0 : index
    %153 = vector.load %arg2[%152, %c0_89] : memref<10000x32xf32, #tpu.memory_space<vmem>>, vector<1x32xf32>
    %c5_90 = arith.constant 5 : index
    %c32_91 = arith.constant 32 : index
    %154 = vector.load %arg3[%c5_90, %c32_91] : memref<8x128xf32, #tpu.memory_space<vmem>>, vector<1x32xf32>
    tpu.vector_store %arg3[%c5_90, %c32_91], %153 {strides = array<i32>} : memref<8x128xf32, #tpu.memory_space<vmem>>, vector<1x32xf32>,
    %c20_i32_92 = arith.constant 20 : i32
    %155 = arith.addi %0, %c20_i32_92 : i32
    %c2_i32_93 = arith.constant 2 : i32
    %156 = arith.addi %155, %c2_i32_93 : i32
    %157 = arith.index_cast %156 : i32 to index
    %158 = memref.load %arg1[%157] : memref<32xi32, #tpu.memory_space<smem>>
    %159 = arith.index_cast %158 : i32 to index
    %c0_94 = arith.constant 0 : index
    %160 = vector.load %arg2[%159, %c0_94] : memref<10000x32xf32, #tpu.memory_space<vmem>>, vector<1x32xf32>
    %c5_95 = arith.constant 5 : index
    %c64_96 = arith.constant 64 : index
    %161 = vector.load %arg3[%c5_95, %c64_96] : memref<8x128xf32, #tpu.memory_space<vmem>>, vector<1x32xf32>
    tpu.vector_store %arg3[%c5_95, %c64_96], %160 {strides = array<i32>} : memref<8x128xf32, #tpu.memory_space<vmem>>, vector<1x32xf32>,
    %c20_i32_97 = arith.constant 20 : i32
    %162 = arith.addi %0, %c20_i32_97 : i32
    %c3_i32_98 = arith.constant 3 : i32
    %163 = arith.addi %162, %c3_i32_98 : i32
    %164 = arith.index_cast %163 : i32 to index
    %165 = memref.load %arg1[%164] : memref<32xi32, #tpu.memory_space<smem>>
    %166 = arith.index_cast %165 : i32 to index
    %c0_99 = arith.constant 0 : index
    %167 = vector.load %arg2[%166, %c0_99] : memref<10000x32xf32, #tpu.memory_space<vmem>>, vector<1x32xf32>
    %c5_100 = arith.constant 5 : index
    %c96_101 = arith.constant 96 : index
    %168 = vector.load %arg3[%c5_100, %c96_101] : memref<8x128xf32, #tpu.memory_space<vmem>>, vector<1x32xf32>
    tpu.vector_store %arg3[%c5_100, %c96_101], %167 {strides = array<i32>} : memref<8x128xf32, #tpu.memory_space<vmem>>, vector<1x32xf32>,
    %c24_i32 = arith.constant 24 : i32
    %169 = arith.addi %0, %c24_i32 : i32
    %c0_i32_102 = arith.constant 0 : i32
    %170 = arith.addi %169, %c0_i32_102 : i32
    %171 = arith.index_cast %170 : i32 to index
    %172 = memref.load %arg1[%171] : memref<32xi32, #tpu.memory_space<smem>>
    %173 = arith.index_cast %172 : i32 to index
    %c0_103 = arith.constant 0 : index
    %174 = vector.load %arg2[%173, %c0_103] : memref<10000x32xf32, #tpu.memory_space<vmem>>, vector<1x32xf32>
    %c6 = arith.constant 6 : index
    %c0_104 = arith.constant 0 : index
    %175 = vector.load %arg3[%c6, %c0_104] : memref<8x128xf32, #tpu.memory_space<vmem>>, vector<1x32xf32>
    tpu.vector_store %arg3[%c6, %c0_104], %174 {strides = array<i32>} : memref<8x128xf32, #tpu.memory_space<vmem>>, vector<1x32xf32>,
    %c24_i32_105 = arith.constant 24 : i32
    %176 = arith.addi %0, %c24_i32_105 : i32
    %c1_i32_106 = arith.constant 1 : i32
    %177 = arith.addi %176, %c1_i32_106 : i32
    %178 = arith.index_cast %177 : i32 to index
    %179 = memref.load %arg1[%178] : memref<32xi32, #tpu.memory_space<smem>>
    %180 = arith.index_cast %179 : i32 to index
    %c0_107 = arith.constant 0 : index
    %181 = vector.load %arg2[%180, %c0_107] : memref<10000x32xf32, #tpu.memory_space<vmem>>, vector<1x32xf32>
    %c6_108 = arith.constant 6 : index
    %c32_109 = arith.constant 32 : index
    %182 = vector.load %arg3[%c6_108, %c32_109] : memref<8x128xf32, #tpu.memory_space<vmem>>, vector<1x32xf32>
    tpu.vector_store %arg3[%c6_108, %c32_109], %181 {strides = array<i32>} : memref<8x128xf32, #tpu.memory_space<vmem>>, vector<1x32xf32>,
    %c24_i32_110 = arith.constant 24 : i32
    %183 = arith.addi %0, %c24_i32_110 : i32
    %c2_i32_111 = arith.constant 2 : i32
    %184 = arith.addi %183, %c2_i32_111 : i32
    %185 = arith.index_cast %184 : i32 to index
    %186 = memref.load %arg1[%185] : memref<32xi32, #tpu.memory_space<smem>>
    %187 = arith.index_cast %186 : i32 to index
    %c0_112 = arith.constant 0 : index
    %188 = vector.load %arg2[%187, %c0_112] : memref<10000x32xf32, #tpu.memory_space<vmem>>, vector<1x32xf32>
    %c6_113 = arith.constant 6 : index
    %c64_114 = arith.constant 64 : index
    %189 = vector.load %arg3[%c6_113, %c64_114] : memref<8x128xf32, #tpu.memory_space<vmem>>, vector<1x32xf32>
    tpu.vector_store %arg3[%c6_113, %c64_114], %188 {strides = array<i32>} : memref<8x128xf32, #tpu.memory_space<vmem>>, vector<1x32xf32>,
    %c24_i32_115 = arith.constant 24 : i32
    %190 = arith.addi %0, %c24_i32_115 : i32
    %c3_i32_116 = arith.constant 3 : i32
    %191 = arith.addi %190, %c3_i32_116 : i32
    %192 = arith.index_cast %191 : i32 to index
    %193 = memref.load %arg1[%192] : memref<32xi32, #tpu.memory_space<smem>>
    %194 = arith.index_cast %193 : i32 to index
    %c0_117 = arith.constant 0 : index
    %195 = vector.load %arg2[%194, %c0_117] : memref<10000x32xf32, #tpu.memory_space<vmem>>, vector<1x32xf32>
    %c6_118 = arith.constant 6 : index
    %c96_119 = arith.constant 96 : index
    %196 = vector.load %arg3[%c6_118, %c96_119] : memref<8x128xf32, #tpu.memory_space<vmem>>, vector<1x32xf32>
    tpu.vector_store %arg3[%c6_118, %c96_119], %195 {strides = array<i32>} : memref<8x128xf32, #tpu.memory_space<vmem>>, vector<1x32xf32>,
    %c28_i32 = arith.constant 28 : i32
    %197 = arith.addi %0, %c28_i32 : i32
    %c0_i32_120 = arith.constant 0 : i32
    %198 = arith.addi %197, %c0_i32_120 : i32
    %199 = arith.index_cast %198 : i32 to index
    %200 = memref.load %arg1[%199] : memref<32xi32, #tpu.memory_space<smem>>
    %201 = arith.index_cast %200 : i32 to index
    %c0_121 = arith.constant 0 : index
    %202 = vector.load %arg2[%201, %c0_121] : memref<10000x32xf32, #tpu.memory_space<vmem>>, vector<1x32xf32>
    %c7 = arith.constant 7 : index
    %c0_122 = arith.constant 0 : index
    %203 = vector.load %arg3[%c7, %c0_122] : memref<8x128xf32, #tpu.memory_space<vmem>>, vector<1x32xf32>
    tpu.vector_store %arg3[%c7, %c0_122], %202 {strides = array<i32>} : memref<8x128xf32, #tpu.memory_space<vmem>>, vector<1x32xf32>,
    %c28_i32_123 = arith.constant 28 : i32
    %204 = arith.addi %0, %c28_i32_123 : i32
    %c1_i32_124 = arith.constant 1 : i32
    %205 = arith.addi %204, %c1_i32_124 : i32
    %206 = arith.index_cast %205 : i32 to index
    %207 = memref.load %arg1[%206] : memref<32xi32, #tpu.memory_space<smem>>
    %208 = arith.index_cast %207 : i32 to index
    %c0_125 = arith.constant 0 : index
    %209 = vector.load %arg2[%208, %c0_125] : memref<10000x32xf32, #tpu.memory_space<vmem>>, vector<1x32xf32>
    %c7_126 = arith.constant 7 : index
    %c32_127 = arith.constant 32 : index
    %210 = vector.load %arg3[%c7_126, %c32_127] : memref<8x128xf32, #tpu.memory_space<vmem>>, vector<1x32xf32>
    tpu.vector_store %arg3[%c7_126, %c32_127], %209 {strides = array<i32>} : memref<8x128xf32, #tpu.memory_space<vmem>>, vector<1x32xf32>,
    %c28_i32_128 = arith.constant 28 : i32
    %211 = arith.addi %0, %c28_i32_128 : i32
    %c2_i32_129 = arith.constant 2 : i32
    %212 = arith.addi %211, %c2_i32_129 : i32
    %213 = arith.index_cast %212 : i32 to index
    %214 = memref.load %arg1[%213] : memref<32xi32, #tpu.memory_space<smem>>
    %215 = arith.index_cast %214 : i32 to index
    %c0_130 = arith.constant 0 : index
    %216 = vector.load %arg2[%215, %c0_130] : memref<10000x32xf32, #tpu.memory_space<vmem>>, vector<1x32xf32>
    %c7_131 = arith.constant 7 : index
    %c64_132 = arith.constant 64 : index
    %217 = vector.load %arg3[%c7_131, %c64_132] : memref<8x128xf32, #tpu.memory_space<vmem>>, vector<1x32xf32>
    tpu.vector_store %arg3[%c7_131, %c64_132], %216 {strides = array<i32>} : memref<8x128xf32, #tpu.memory_space<vmem>>, vector<1x32xf32>,
    %c28_i32_133 = arith.constant 28 : i32
    %218 = arith.addi %0, %c28_i32_133 : i32
    %c3_i32_134 = arith.constant 3 : i32
    %219 = arith.addi %218, %c3_i32_134 : i32
    %220 = arith.index_cast %219 : i32 to index
    %221 = memref.load %arg1[%220] : memref<32xi32, #tpu.memory_space<smem>>
    %222 = arith.index_cast %221 : i32 to index
    %c0_135 = arith.constant 0 : index
    %223 = vector.load %arg2[%222, %c0_135] : memref<10000x32xf32, #tpu.memory_space<vmem>>, vector<1x32xf32>
    %c7_136 = arith.constant 7 : index
    %c96_137 = arith.constant 96 : index
    %224 = vector.load %arg3[%c7_136, %c96_137] : memref<8x128xf32, #tpu.memory_space<vmem>>, vector<1x32xf32>
    tpu.vector_store %arg3[%c7_136, %c96_137], %223 {strides = array<i32>} : memref<8x128xf32, #tpu.memory_space<vmem>>, vector<1x32xf32>,
    return
  }
  func.func @transform_0(%arg0: i32, %arg1: memref<32xi32, #tpu.memory_space<smem>>) -> (i32, i32) {
    %c0_i32 = arith.constant 0 : i32
    %c0_i32_0 = arith.constant 0 : i32
    %c0_i32_1 = arith.constant 0 : i32
    return %c0_i32, %c0_i32_0 : i32, i32
  }
  func.func @transform_1(%arg0: i32, %arg1: memref<32xi32, #tpu.memory_space<smem>>) -> (i32, i32) {
    %c0_i32 = arith.constant 0 : i32
    %c0_i32_0 = arith.constant 0 : i32
    return %arg0, %c0_i32 : i32, i32
  }
}

</mosaic_0001>

<bundles_post_ra>
// kernel: tpu_custom_call.1
= control target key start
LH: loop header
LB: loop body
LE: loop exit
PB: predicated region body
PF: predicated region fallthrough
CT: control target
= control target key end

     0   :  { %s402_s12 = smov [#allocation3]   ;;  %s580_s0 = inlined_call_operand.vmem [shape: s32[32], index: 0, kind: input, shape index: {}]   ;;  %s581_s1 = inlined_call_operand.vmem [shape: f32[10000,32], index: 1, kind: input, shape index: {}]   ;;  %s582_s2 = inlined_call_operand.hbm [shape: f32[8,128], index: 2, kind: output, shape index: {}]  }
   0x1   :  { %s8_s11 = sshll.u32 %s580_s0, 4  ;;  %s9_s11 = int_to_ptr.vmem [resolvable:$true] %s8_s11 }
   0x2   :  { %11 = dma.vmem_to_smem %s9_s11, 16, %s402_s12, [#allocation2] }
   0x3   :  { %398 = dma.done.wait [#allocation2], 16 }
   0x4   :  { %399 = vsyncadd [#allocation2], 4294967280 }
   0x5   :  { %14 = sfence }
   0x6   :  { %s328_s13 = sld [smem:[#allocation3 + $0x3]] }
   0x7   :  { %15 = vsyncpa [#allocation5], 0  ;;  %s326_s14 = sld [smem:[#allocation3 + $0x1]]  ;;  %s403_s23 = smov 96   ;;  %vm22_vm0 = vcmask 253952   ;;  %vm32_vm1 = vcmask 516352  }
   0x8   :  { %s330_s15 = sld [smem:[#allocation3 + $0x5]]  ;;  %s404_s24 = smov 32   ;;  %vm42_vm2 = vcmask 778752   ;;  %vm52_vm3 = vcmask 1041152  }
   0x9   :  { %s327_s16 = sld [smem:[#allocation3 + $0x2]]  ;;  %s405_s9 = smov 64  }
   0xa   :  { %s331_s20 = sld [smem:[#allocation3 + $0x6]] }
   0xb   :  { %s332_s25 = sld [smem:[#allocation3 + $0x7]] }
   0xc   :  { %s46_s19 = scalar_lea.vmem %s581_s1, %s328_s13  ;;  %s335_s29 = sld [smem:[#allocation3 + $0xa]] }
   0xd   :  { %v47_v0 = vld [vmem:[%s46_s19] sm:$0x1]  ;;  %s26_s0 = scalar_lea.vmem %s581_s1, %s326_s14  ;;  %s334_s5 = sld [smem:[#allocation3 + $0x9]] }
   0xe   :  { %49 = vrot.lane.b32.xlu1 %v47_v0, %s403_s23  ;;  %v27_v1 = vld [vmem:[%s26_s0] sm:$0x1]  ;;  %s61_s28 = scalar_lea.vmem %s581_s1, %s330_s15  ;;  %s336_s13 = sld [smem:[#allocation3 + $0xb]] }
   0xf   :  { %29 = vrot.lane.b32.xlu0 %v27_v1, %s404_s24  ;;  %s36_s4 = scalar_lea.vmem %s581_s1, %s327_s16  ;;  %v62_v2 = vld [vmem:[%s61_s28] sm:$0x1]  ;;  %s342_s17 = sld [smem:[#allocation3 + $0x11]] }
  0x10   :  { %s70_s8 = scalar_lea.vmem %s581_s1, %s331_s20  ;;  %v37_v4 = vld [vmem:[%s36_s4] sm:$0x1]  ;;  %s338_s21 = sld [smem:[#allocation3 + $0xd]] }
  0x11   :  { %v71_v3 = vld [vmem:[%s70_s8] sm:$0x1]  ;;  %s79_s12 = scalar_lea.vmem %s581_s1, %s332_s25  ;;  %s346_s26 = sld [smem:[#allocation3 + $0x15]] }
  0x12   :  { %73 = vrot.lane.b32.xlu2 %v71_v3, %s405_s9  ;;  %s102_s16 = scalar_lea.vmem %s581_s1, %s335_s29  ;;  %v80_v5 = vld [vmem:[%s79_s12] sm:$0x1]  ;;  %s354_s30 = sld [smem:[#allocation3 + $0x1d]] }
  0x13   :  { %s93_s20 = scalar_lea.vmem %s581_s1, %s334_s5  ;;  %v103_v6 = vld [vmem:[%s102_s16] sm:$0x1]  ;;  %s350_s6 = sld [smem:[#allocation3 + $0x19]] }
  0x14   :  { %v94_v7 = vld [vmem:[%s93_s20] sm:$0x1]  ;;  %s111_s25 = scalar_lea.vmem %s581_s1, %s336_s13  ;;  %s339_s11 = sld [smem:[#allocation3 + $0xe]] }
  0x15   :  { %s157_s29 = scalar_lea.vmem %s581_s1, %s342_s17  ;;  %v112_v8 = vld [vmem:[%s111_s25] sm:$0x1]  ;;  %s347_s15 = sld [smem:[#allocation3 + $0x16]] }
  0x16   :  { %64 = vrot.lane.b32.xlu1 %v62_v2, %s404_s24  ;;  %s125_s5 = scalar_lea.vmem %s581_s1, %s338_s21  ;;  %v158_v9 = vld [vmem:[%s157_s29] sm:$0x1]  ;;  %s343_s19 = sld [smem:[#allocation3 + $0x12]] }
  0x17   :  { %39 = vrot.lane.b32.xlu0 %v37_v4, %s405_s9  ;;  %v126_v10 = vld [vmem:[%s125_s5] sm:$0x1]  ;;  %s189_s10 = scalar_lea.vmem %s581_s1, %s346_s26  ;;  %s351_s0 = sld [smem:[#allocation3 + $0x1a]] }
  0x18   :  { %s253_s14 = scalar_lea.vmem %s581_s1, %s354_s30  ;;  %v190_v11 = vld [vmem:[%s189_s10] sm:$0x1]  ;;  %s340_s28 = sld [smem:[#allocation3 + $0xf]] }
  0x19   :  { %s221_s18 = scalar_lea.vmem %s581_s1, %s350_s6  ;;  %v254_v12 = vld [vmem:[%s253_s14] sm:$0x1]  ;;  %s355_s4 = sld [smem:[#allocation3 + $0x1e]] }
  0x1a   :  { %82 = vrot.lane.b32.xlu2 %v80_v5, %s403_s23  ;;  %v222_v13 = vld [vmem:[%s221_s18] sm:$0x1]  ;;  %s134_s22 = scalar_lea.vmem %s581_s1, %s339_s11  ;;  %s344_s7 = sld [smem:[#allocation3 + $0x13]] }
  0x1b   :  { %s198_s27 = scalar_lea.vmem %s581_s1, %s347_s15  ;;  %v135_v14 = vld [vmem:[%s134_s22] sm:$0x1]  ;;  %s352_s12 = sld [smem:[#allocation3 + $0x1b]] }
  0x1c   :  { %s166_s3 = scalar_lea.vmem %s581_s1, %s343_s19  ;;  %v199_v15 = vld [vmem:[%s198_s27] sm:$0x1]  ;;  %s348_s16 = sld [smem:[#allocation3 + $0x17]] }
  0x1d   :  { %v167_v16 = vld [vmem:[%s166_s3] sm:$0x1]  ;;  %s356_s20 = sld [smem:[#allocation3 + $0x1f]] }
  0x1e   :  { %105 = vrot.lane.b32.xlu1 %v103_v6, %s405_s9  ;;  %s143_s11 = scalar_lea.vmem %s581_s1, %s340_s28  ;;  %s329_s3 = sld [smem:[#allocation3 + $0x4]] }
  0x1f   :  { %96 = vrot.lane.b32.xlu0 %v94_v7, %s404_s24  ;;  %s262_s15 = scalar_lea.vmem %s581_s1, %s355_s4  ;;  %v144_v18 = vld [vmem:[%s143_s11] sm:$0x1]  ;;  %s333_s10 = sld [smem:[#allocation3 + $0x8]] }
  0x20   :  { %v263_v19 = vld [vmem:[%s262_s15] sm:$0x1]  ;;  %s175_s19 = scalar_lea.vmem %s581_s1, %s344_s7  ;;  %s345_s11 = sld [smem:[#allocation3 + $0x14]] }
  0x21   :  { %v176_v20 = vld [vmem:[%s175_s19] sm:$0x1]  ;;  %s337_s15 = sld [smem:[#allocation3 + $0xc]]  ;;  %s285_s7 = sshll.u32 %s582_s2, 4  ;;  %s286_s7 = int_to_ptr.hbm [resolvable:$true] %s285_s7 }
  0x22   :  { %114 = vrot.lane.b32.xlu2 %v112_v8, %s403_s23  ;;  %s207_s27 = scalar_lea.vmem %s581_s1, %s348_s16  ;;  %s353_s16 = sld [smem:[#allocation3 + $0x1c]] }
  0x23   :  { %v208_v22 = vld [vmem:[%s207_s27] sm:$0x1]  ;;  %s271_s30 = scalar_lea.vmem %s581_s1, %s356_s20  ;;  %s349_s27 = sld [smem:[#allocation3 + $0x18]] }
  0x24   :  { %v272_v23 = vld [vmem:[%s271_s30] sm:$0x1]  ;;  %s56_s8 = scalar_lea.vmem %s581_s1, %s329_s3 }
  0x25   :  { %v57_v25 = vld [vmem:[%s56_s8] sm:$0x1]  ;;  %s88_s14 = scalar_lea.vmem %s581_s1, %s333_s10 }
  0x26   :  { %160 = vrot.lane.b32.xlu1 %v158_v9, %s404_s24  ;;  %58 = vst.msk [vmem:[#allocation4 + $0x1] sm:$0x1] %vm22_vm0, %v57_v25  ;;  %v89_v27 = vld [vmem:[%s88_s14] sm:$0x1]  ;;  %s184_s19 = scalar_lea.vmem %s581_s1, %s345_s11 }
  0x27   :  { %128 = vrot.lane.b32.xlu0 %v126_v10, %s404_s24  ;;  %90 = vst.msk [vmem:[#allocation4 + $0x2] sm:$0x1] %vm22_vm0, %v89_v27  ;;  %v185_v28 = vld [vmem:[%s184_s19] sm:$0x1]  ;;  %s120_s26 = scalar_lea.vmem %s581_s1, %s337_s15 }
  0x28   :  { %186 = vst.msk [vmem:[#allocation4 + $0x5] sm:$0x1] %vm22_vm0, %v185_v28  ;;  %s248_s30 = scalar_lea.vmem %s581_s1, %s353_s16  ;;  %v121_v31 = vld [vmem:[%s120_s26] sm:$0x1] }
  0x29   :  { %122 = vst.msk [vmem:[#allocation4 + $0x3] sm:$0x1] %vm22_vm0, %v121_v31  ;;  %v249_v32 = vld [vmem:[%s248_s30] sm:$0x1]  ;;  %s216_s4 = scalar_lea.vmem %s581_s1, %s349_s27 }
  0x2a   :  { %192 = vrot.lane.b32.xlu2 %v190_v11, %s404_s24  ;;  %250 = vst.msk [vmem:[#allocation4 + $0x7] sm:$0x1] %vm22_vm0, %v249_v32  ;;  %v217_v36 = vld [vmem:[%s216_s4] sm:$0x1] }
  0x2b   :  { %218 = vst.msk [vmem:[#allocation4 + $0x6] sm:$0x1] %vm22_vm0, %v217_v36 }
  0x2e   :  { %256 = vrot.lane.b32.xlu1 %v254_v12, %s404_s24 }
  0x2f   :  { %224 = vrot.lane.b32.xlu0 %v222_v13, %s404_s24  ;;  %s230_s24 = scalar_lea.vmem %s581_s1, %s351_s0  ;;  %s239_s0 = scalar_lea.vmem %s581_s1, %s352_s12 }
  0x30   :  { %v231_v17 = vld [vmem:[%s230_s24] sm:$0x1] }
  0x31   :  { %v240_v21 = vld [vmem:[%s239_s0] sm:$0x1] }
  0x32   :  { %137 = vrot.lane.b32.xlu2 %v135_v14, %s405_s9 }
  0x36   :  { %201 = vrot.lane.b32.xlu1 %v199_v15, %s405_s9 }
  0x37   :  { %169 = vrot.lane.b32.xlu0 %v167_v16, %s405_s9 }
  0x3a   :  { %233 = vrot.lane.b32.xlu2 %v231_v17, %s405_s9 }
  0x3e   :  { %146 = vrot.lane.b32.xlu1 %v144_v18, %s403_s23 }
  0x3f   :  { %265 = vrot.lane.b32.xlu0 %v263_v19, %s405_s9  ;;  %s19_s9 = sld [smem:[#allocation3]] }
  0x42   :  { %178 = vrot.lane.b32.xlu2 %v176_v20, %s403_s23 }
  0x45   :  { %s20_s6 = scalar_lea.vmem %s581_s1, %s19_s9 }
  0x46   :  { %242 = vrot.lane.b32.xlu1 %v240_v21, %s403_s23  ;;  %v21_v24 = vld [vmem:[%s20_s6] sm:$0x1] }
  0x47   :  { %210 = vrot.lane.b32.xlu0 %v208_v22, %s403_s23  ;;  %23 = vst.msk [vmem:[#allocation4] sm:$0x1] %vm22_vm0, %v21_v24 }
  0x4a   :  { %274 = vrot.lane.b32.xlu2 %v272_v23, %s403_s23  ;;  %s341_s23 = sld [smem:[#allocation3 + $0x10]] }
  0x50   :  { %s152_s22 = scalar_lea.vmem %s581_s1, %s341_s23  ;;  %s406_s1 = smov [#allocation4]  }
  0x51   :  { %v153_v29 = vld [vmem:[%s152_s22] sm:$0x1]  ;;  %s283_s5 = sshll.u32 %s406_s1, 4  ;;  %s284_s5 = int_to_ptr.vmem [resolvable:$true] %s283_s5 }
  0x52   :  { %154 = vst.msk [vmem:[#allocation4 + $0x4] sm:$0x1] %vm22_vm0, %v153_v29 }
  0x6c   :  { %v74_v26 = vpop.permute.xlu2 %73 }
  0x74   :  { %v83_v30 = vpop.permute.xlu2 %82 }
  0x7c   :  { %v115_v33 = vpop.permute.xlu2 %114 }
  0x80   :  { %v50_v34 = vpop.permute.xlu1 %49 }
  0x81   :  { %v30_v35 = vpop.permute.xlu0 %29 }
  0x82   :  { %33 = vst.msk [vmem:[#allocation4] sm:$0x1] %vm32_vm1, %v30_v35 }
  0x84   :  { %v193_v37 = vpop.permute.xlu2 %192 }
  0x85   :  { %195 = vst.msk [vmem:[#allocation4 + $0x5] sm:$0x1] %vm32_vm1, %v193_v37 }
  0x88   :  { %v65_v38 = vpop.permute.xlu1 %64 }
  0x89   :  { %67 = vst.msk [vmem:[#allocation4 + $0x1] sm:$0x1] %vm32_vm1, %v65_v38  ;;  %v40_v39 = vpop.permute.xlu0 %39 }
  0x8a   :  { %76 = vst.msk [vmem:[#allocation4 + $0x1] sm:$0x1] %vm42_vm2, %v74_v26 }
  0x8b   :  { %85 = vst.msk [vmem:[#allocation4 + $0x1] sm:$0x1] %vm52_vm3, %v83_v30 }
  0x8c   :  { %43 = vst.msk [vmem:[#allocation4] sm:$0x1] %vm42_vm2, %v40_v39  ;;  %v138_v42 = vpop.permute.xlu2 %137 }
  0x8d   :  { %53 = vst.msk [vmem:[#allocation4] sm:$0x1] %vm52_vm3, %v50_v34 }
  0x90   :  { %v106_v40 = vpop.permute.xlu1 %105 }
  0x91   :  { %v97_v41 = vpop.permute.xlu0 %96 }
  0x92   :  { %99 = vst.msk [vmem:[#allocation4 + $0x2] sm:$0x1] %vm32_vm1, %v97_v41 }
  0x93   :  { %108 = vst.msk [vmem:[#allocation4 + $0x2] sm:$0x1] %vm42_vm2, %v106_v40 }
  0x94   :  { %117 = vst.msk [vmem:[#allocation4 + $0x2] sm:$0x1] %vm52_vm3, %v115_v33  ;;  %v234_v45 = vpop.permute.xlu2 %233 }
  0x98   :  { %v161_v43 = vpop.permute.xlu1 %160 }
  0x99   :  { %163 = vst.msk [vmem:[#allocation4 + $0x4] sm:$0x1] %vm32_vm1, %v161_v43  ;;  %v129_v44 = vpop.permute.xlu0 %128 }
  0x9a   :  { %131 = vst.msk [vmem:[#allocation4 + $0x3] sm:$0x1] %vm32_vm1, %v129_v44 }
  0x9b   :  { %140 = vst.msk [vmem:[#allocation4 + $0x3] sm:$0x1] %vm42_vm2, %v138_v42 }
  0x9c   :  { %v179_v48 = vpop.permute.xlu2 %178 }
  0xa0   :  { %v257_v46 = vpop.permute.xlu1 %256 }
  0xa1   :  { %259 = vst.msk [vmem:[#allocation4 + $0x7] sm:$0x1] %vm32_vm1, %v257_v46  ;;  %v225_v47 = vpop.permute.xlu0 %224 }
  0xa2   :  { %227 = vst.msk [vmem:[#allocation4 + $0x6] sm:$0x1] %vm32_vm1, %v225_v47 }
  0xa3   :  { %236 = vst.msk [vmem:[#allocation4 + $0x6] sm:$0x1] %vm42_vm2, %v234_v45 }
  0xa4   :  { %v275_v52 = vpop.permute.xlu2 %274 }
  0xa8   :  { %v202_v49 = vpop.permute.xlu1 %201 }
  0xa9   :  { %204 = vst.msk [vmem:[#allocation4 + $0x5] sm:$0x1] %vm42_vm2, %v202_v49  ;;  %v170_v50 = vpop.permute.xlu0 %169 }
  0xaa   :  { %172 = vst.msk [vmem:[#allocation4 + $0x4] sm:$0x1] %vm42_vm2, %v170_v50 }
  0xab   :  { %181 = vst.msk [vmem:[#allocation4 + $0x4] sm:$0x1] %vm52_vm3, %v179_v48 }
  0xb0   :  { %v147_v51 = vpop.permute.xlu1 %146 }
  0xb1   :  { %149 = vst.msk [vmem:[#allocation4 + $0x3] sm:$0x1] %vm52_vm3, %v147_v51  ;;  %v266_v53 = vpop.permute.xlu0 %265 }
  0xb2   :  { %268 = vst.msk [vmem:[#allocation4 + $0x7] sm:$0x1] %vm42_vm2, %v266_v53 }
  0xb3   :  { %277 = vst.msk [vmem:[#allocation4 + $0x7] sm:$0x1] %vm52_vm3, %v275_v52 }
  0xb8   :  { %v243_v54 = vpop.permute.xlu1 %242 }
  0xb9   :  { %245 = vst.msk [vmem:[#allocation4 + $0x6] sm:$0x1] %vm52_vm3, %v243_v54  ;;  %v211_v55 = vpop.permute.xlu0 %210 }
  0xba   :  { %213 = vst.msk [vmem:[#allocation4 + $0x5] sm:$0x1] %vm52_vm3, %v211_v55 }
  0xbb   :  { %288 = dma.vmem_to_hbm [thread:$0]  %s284_s5, 128, %s286_s7, [#allocation5]  }
  0xbc   :  { %400 = dma.done.wait [#allocation5], 128  }
  0xbd   :  { %401 = vsyncadd [#allocation5], 4294967168 }
  0xbe   :  { %293 = vsyncpa [#allocation5], 1 }

</bundles_post_ra>
